<compile_context>
chip_gen: v5e
topology: v5e:2x2
jax: 0.10.0
libtpu: 0.0.40
codegen_flags: <defaults>
</compile_context>

<pallas_src>
import functools
import math

import jax
import jax.numpy as jnp
import numpy as np
from jax import lax
from jax.experimental import pallas as pl
from jax.experimental.pallas import tpu as pltpu

_NEG_BIG = -1e30           # finite "-inf": robust even for fully-masked chunks


# --------------------------------------------------------------------------
# helpers
# --------------------------------------------------------------------------
def _n_top(T, factor):
    n = int(factor * np.ceil(np.log(T)))
    return min(n, T)


def _rup(x, m):
    return ((x + m - 1) // m) * m


def _blk_bytes(shape, itemsize):
    """Bytes of a VMEM block after (8, 128) tile padding (conservative)."""
    s = list(shape)
    if len(s) == 1:
        return _rup(s[0], 128) * itemsize
    s[-1] = _rup(s[-1], 128)
    s[-2] = _rup(s[-2], 8)
    n = 1
    for d in s:
        n *= d
    return n * itemsize


def _vmem_limit_bytes():
    """Scoped-VMEM limit sized off the actual chip (v5e/v6e: 128 MiB,
    v7x: 64 MiB per core), with headroom for compiler scratch."""
    cap = None
    try:
        info = pltpu.get_tpu_info()
        for name in ("vmem_capacity_bytes", "vmem_size_bytes", "vmem_bytes"):
            cap = getattr(info, name, None)
            if cap:
                break
    except Exception:
        cap = None
    if not cap:
        cap = 64 * 1024 * 1024                      # conservative: v7x per-core
    limit = min(int(cap) - (16 << 20), 100 << 20)
    return max(limit, 32 << 20)


def _pick_bh_block(BH, T, E, u, budget_bytes, max_nb=8):
    """Largest BH tile (<= max_nb, so the per-head loop stays fully unrolled)
    that divides BH and whose double-buffered blocks fit the budget.  Prefers
    a divisor giving an even grid (>= 2 steps) for v7x megacore sharding."""
    key_block = T if T <= 512 else 512
    row_block = T if T <= 256 else 256

    def step_bytes(nb):
        attn = (2 * _blk_bytes((nb, u, 1), 4)          # pos_col
                + 2 * _blk_bytes((nb, u, E), 2)        # q_red  (bf16)
                + 4 * _blk_bytes((nb, T, E), 2)        # k, v   (bf16)
                + 2 * _blk_bytes((nb, T, E), 4)        # ctx out (f32)
                + 4 * _blk_bytes((u, T), 4)            # in-kernel s / exp
                + 2 * _blk_bytes((row_block, E), 4))   # cumsum chunk
        meas = (4 * _blk_bytes((nb, T, E), 2)          # q, k   (bf16)
                + 2 * _blk_bytes((T, T), 2)            # cnt    (grid-invariant)
                + 2 * _blk_bytes((nb, T, 1), 4)        # m out
                + 3 * _blk_bytes((T, key_block), 4))   # in-kernel s chunk
        return max(attn, meas) + (2 << 20)

    best, best_even = 1, None
    for nb in range(1, min(BH, max_nb) + 1):
        if BH % nb:
            continue
        if step_bytes(nb) > budget_bytes:
            continue
        best = nb
        g = BH // nb
        if g >= 2 and g % 2 == 0:
            best_even = nb
    return best_even if best_even is not None else best


def _cparams(vmem_limit):
    return pltpu.CompilerParams(
        dimension_semantics=("parallel",),
        vmem_limit_bytes=int(vmem_limit))


# --------------------------------------------------------------------------
# Kernel 1: sparsity measure  M = max_sampled(Q K^T) - sum_sampled(Q K^T) / T
# computed flash-style over key chunks; the sampled-sum reuses the chunk
# scores (rowsum(s * cnt)), so no cnt @ K matmul and no (T, T) intermediates.
# --------------------------------------------------------------------------
def _measure_kernel(q_ref, k_ref, cnt_ref, m_ref, *, key_block):
    nb, t, _ = q_ref.shape
    inv_t = 1.0 / t

    for b in range(nb):                                 # statically unrolled
        q = q_ref[b]                                    # (T, E) bf16
        acc_max = jnp.full((t, 1), _NEG_BIG, jnp.float32)
        acc_sum = jnp.zeros((t, 1), jnp.float32)
        for c0 in range(0, t, key_block):
            cw = min(key_block, t - c0)
            kc = k_ref[b, c0:c0 + cw, :]                # (cw, E) bf16
            s = lax.dot_general(q, kc, (((1,), (1,)), ((), ())),
                                preferred_element_type=jnp.float32)   # (T, cw)
            cntc = cnt_ref[:, c0:c0 + cw].astype(jnp.float32)
            acc_max = jnp.maximum(
                acc_max,
                jnp.max(jnp.where(cntc > 0.0, s, _NEG_BIG),
                        axis=-1, keepdims=True))
            acc_sum = acc_sum + jnp.sum(s * cntc, axis=-1, keepdims=True)
        m_ref[b] = acc_max - acc_sum * inv_t


# --------------------------------------------------------------------------
# Kernel 2: top-query attention (causal ProbMask + softmax + attn @ V) fused
# with the blocked cumsum(V) initial context and an exact in-place scatter of
# the attended rows (dynamic row stores driven by SMEM indices).
# --------------------------------------------------------------------------
def _attn_ctx_kernel(idx_ref, pos_col_ref, qr_ref, k_ref, v_ref, ctx_ref, *,
                     scale, row_block):
    nb, t, feat = k_ref.shape
    u = qr_ref.shape[1]
    base = pl.program_id(0) * nb

    # constants hoisted out of the per-head loop
    key_iota = lax.broadcasted_iota(jnp.int32, (u, t), 1)
    tri = {}
    for r0 in range(0, t, row_block):
        rw = min(row_block, t - r0)
        if rw not in tri:
            r_i = lax.broadcasted_iota(jnp.int32, (rw, rw), 0)
            c_i = lax.broadcasted_iota(jnp.int32, (rw, rw), 1)
            tri[rw] = (c_i <= r_i).astype(jnp.bfloat16)

    for b in range(nb):                                 # statically unrolled
        qr = qr_ref[b]                                  # (u, E) bf16
        k = k_ref[b]                                    # (T, E) bf16
        p_col = pos_col_ref[b]                          # (u, 1) int32

        # scores + causal ProbMask (keys strictly after the query position)
        s = lax.dot_general(qr, k, (((1,), (1,)), ((), ())),
                            preferred_element_type=jnp.float32) * scale  # (u,T)
        s = jnp.where(key_iota > p_col, _NEG_BIG, s)

        # softmax in f32 (exact divide so probabilities match the reference
        # path bit-for-bit before the bf16 cast); attn @ V on the MXU in bf16.
        smax = jnp.max(s, axis=-1, keepdims=True)
        ex = jnp.exp(s - smax)
        attn = (ex / jnp.sum(ex, axis=-1, keepdims=True)).astype(jnp.bfloat16)
        rows = jnp.dot(attn, v_ref[b],
                       preferred_element_type=jnp.float32)              # (u,E)

        # initial context = cumsum(V): blockwise lower-tri matmul + carry
        carry = jnp.zeros((1, feat), jnp.float32)
        for r0 in range(0, t, row_block):
            rw = min(row_block, t - r0)
            vchunk = v_ref[b, r0:r0 + rw, :]                             # bf16
            cchunk = jnp.dot(tri[rw], vchunk,
                             preferred_element_type=jnp.float32) + carry
            ctx_ref[b, r0:r0 + rw, :] = cchunk
            carry = cchunk[rw - 1:rw, :]

        # exact scatter: overwrite the attended rows (indices read from SMEM)
        for j in range(u):
            pos = idx_ref[base + b, j]
            ctx_ref[b, pl.ds(pos, 1), :] = rows[j:j + 1, :]


# --------------------------------------------------------------------------
# pallas_call wrappers (grid over BH tiles, "parallel")
# --------------------------------------------------------------------------
def _measure_call(q, k, cnt, nb, key_block, vmem_limit):
    BH, T, E = q.shape
    return pl.pallas_call(
        functools.partial(_measure_kernel, key_block=key_block),
        grid=(BH // nb,),
        in_specs=[
            pl.BlockSpec((nb, T, E), lambda b: (b, 0, 0)),
            pl.BlockSpec((nb, T, E), lambda b: (b, 0, 0)),
            pl.BlockSpec((T, T), lambda b: (0, 0)),        # grid-invariant
        ],
        out_specs=pl.BlockSpec((nb, T, 1), lambda b: (b, 0, 0)),
        out_shape=jax.ShapeDtypeStruct((BH, T, 1), jnp.float32),
        compiler_params=_cparams(vmem_limit),
    )(q, k, cnt)


def _attn_ctx_call(index, pos_col, q_red, k, v, scale, nb, row_block,
                   vmem_limit):
    BH, T, E = k.shape
    u = q_red.shape[1]
    grid_spec = pltpu.PrefetchScalarGridSpec(
        num_scalar_prefetch=1,                 # top-u indices live in SMEM
        grid=(BH // nb,),
        in_specs=[
            pl.BlockSpec((nb, u, 1), lambda b, idx: (b, 0, 0)),
            pl.BlockSpec((nb, u, E), lambda b, idx: (b, 0, 0)),
            pl.BlockSpec((nb, T, E), lambda b, idx: (b, 0, 0)),
            pl.BlockSpec((nb, T, E), lambda b, idx: (b, 0, 0)),
        ],
        out_specs=pl.BlockSpec((nb, T, E), lambda b, idx: (b, 0, 0)),
    )
    return pl.pallas_call(
        functools.partial(_attn_ctx_kernel, scale=scale, row_block=row_block),
        grid_spec=grid_spec,
        out_shape=jax.ShapeDtypeStruct((BH, T, E), jnp.float32),
        compiler_params=_cparams(vmem_limit),
    )(index, pos_col, q_red, k, v)


# --------------------------------------------------------------------------
# forward pass (eval mode; the module has no learnable parameters)
# --------------------------------------------------------------------------
def _prob_attention_core(q, k, v, idx_sample, *, scale, factor):
    """q/k/v: [BH, T, E] bfloat16; idx_sample: [T, sample_k] int32."""
    BH, T, E = q.shape
    u = _n_top(T, factor)

    # sample multiplicity per (query, key), shared across batch and heads
    cnt = jax.nn.one_hot(idx_sample, T, dtype=jnp.float32).sum(axis=1)
    cnt = cnt.astype(jnp.bfloat16)             # small ints: exact in bf16

    vmem_limit = _vmem_limit_bytes()
    budget = max(16 << 20, vmem_limit // 2)
    nb = _pick_bh_block(BH, T, E, u, budget)
    key_block = T if T <= 512 else 512
    row_block = T if T <= 256 else 256

    m = _measure_call(q, k, cnt, nb, key_block, vmem_limit)[..., 0]   # (BH, T)
    _, index = lax.top_k(m, u)                                        # (BH, u)
    index = index.astype(jnp.int32)

    # gather the top-u queries at the JAX level (removes a full (nb,T,E)
    # input stream and an MXU launch from kernel 2)
    q_red = jnp.take_along_axis(q, index[:, :, None], axis=1)         # (BH,u,E)
    pos_col = index[:, :, None]                                       # (BH,u,1)
    return _attn_ctx_call(index, pos_col, q_red, k, v, scale, nb,
                          row_block, vmem_limit)


def prob_attention(queries, keys, values, idx_sample, *, factor=5, scale=None,
                   mask_flag=True, output_attention=False):
    """ProbAttention forward (eval mode).

    queries/keys/values: [B, T, N, H, D] float32 (the module's convention).
    idx_sample: [T, sample_k] int32 random key indices mirroring
      torch.randint(T_K, (T_Q, sample_k)) in _prob_QK (shared over B, H).
    Returns (context [B, T, N, H, D], None).
    """
    assert mask_flag and not output_attention, \
        "only the default mask_flag=True / output_attention=False path is implemented"
    B, T, N, H, D = queries.shape
    E = N * D
    BH = B * H

    def to_bh_t_e(x):
        x = jnp.transpose(x, (0, 1, 3, 2, 4)).reshape(B, T, H, E)     # B T H E
        return jnp.transpose(x, (0, 2, 1, 3)).reshape(BH, T, E)

    # bf16 MXU operands with f32 accumulation (half the HBM/VMEM traffic).
    q = to_bh_t_e(queries).astype(jnp.bfloat16)
    k = to_bh_t_e(keys).astype(jnp.bfloat16)
    v = to_bh_t_e(values).astype(jnp.bfloat16)

    sc = float(scale) if scale is not None else 1.0 / math.sqrt(D)
    ctx = _prob_attention_core(q, k, v, idx_sample, scale=sc, factor=factor)

    ctx = ctx.reshape(B, H, T, E).transpose(0, 2, 1, 3)               # B T H E
    ctx = ctx.reshape(B, T, H, N, D).transpose(0, 1, 3, 2, 4)         # B T N H D
    # TODO(synk): nn.Dropout(attention_dropout) modeled in eval mode (identity).
    return ctx.astype(queries.dtype), None                            # output_attention=False


# --------------------------------------------------------------------------
# pure-JAX reference (same sampling indices, precision-matched bf16 operands)
# --------------------------------------------------------------------------
def _reference(queries, keys, values, idx_sample, *, factor=5, scale=None):
    B, T, N, H, D = queries.shape
    E = N * D
    BH = B * H

    def to_bh(x):
        x = jnp.transpose(x, (0, 1, 3, 2, 4)).reshape(B, T, H, E)
        return jnp.transpose(x, (0, 2, 1, 3)).reshape(BH, T, E)

    q = to_bh(queries).astype(jnp.bfloat16)
    k = to_bh(keys).astype(jnp.bfloat16)
    v = to_bh(values).astype(jnp.bfloat16)

    u = _n_top(T, factor)
    # mathematically equivalent to _prob_QK's gather of sampled keys
    cnt = jax.nn.one_hot(idx_sample, T, dtype=jnp.float32).sum(axis=1)
    s_full = jnp.einsum('bte,bse->bts', q, k,
                        preferred_element_type=jnp.float32)
    m = (jnp.where(cnt[None] > 0.0, s_full, _NEG_BIG).max(-1)
         - (s_full * cnt[None]).sum(-1) / T)
    _, index = lax.top_k(m, u)

    q_red = jnp.take_along_axis(q, index[:, :, None], axis=1)
    sc = float(scale) if scale is not None else 1.0 / math.sqrt(D)
    scores = jnp.einsum('bue,bke->buk', q_red, k,
                        preferred_element_type=jnp.float32) * sc
    mask = jnp.arange(T)[None, None, :] > index[:, :, None]
    scores = jnp.where(mask, -jnp.inf, scores)
    attn = jax.nn.softmax(scores, axis=-1).astype(jnp.bfloat16)
    rows = jnp.einsum('buk,bke->bue', attn, v,
                      preferred_element_type=jnp.float32)
    ctx = jnp.cumsum(v.astype(jnp.float32), axis=1)
    ctx = ctx.at[jnp.arange(BH)[:, None], index, :].set(rows)
    ctx = ctx.reshape(B, H, T, E).transpose(0, 2, 1, 3)
    ctx = ctx.reshape(B, T, H, N, D).transpose(0, 1, 3, 2, 4)
    return ctx


if __name__ == "__main__":
    B, T, N, H, D = 2, 16, 2, 8, 8      # E = N*D = 16, BH = 16
    factor = 5
    key = jax.random.PRNGKey(0)
    kq, kk, kv, ks = jax.random.split(key, 4)
    queries = jax.random.normal(kq, (B, T, N, H, D), jnp.float32)
    keys_in = jax.random.normal(kk, (B, T, N, H, D), jnp.float32)
    values = jax.random.normal(kv, (B, T, N, H, D), jnp.float32)
    sample_k = _n_top(T, factor)
    idx_sample = jax.random.randint(ks, (T, sample_k), 0, T, dtype=jnp.int32)

    context, attn = prob_attention(queries, keys_in, values, idx_sample,
                                   factor=factor)
    context = jax.block_until_ready(context)

    ref = _reference(queries, keys_in, values, idx_sample, factor=factor)
    assert context.shape == (B, T, N, H, D)
    assert attn is None
    if not bool(jnp.allclose(context, ref, rtol=5e-3, atol=5e-3)):
        err = float(jnp.max(jnp.abs(context - ref)))
        raise AssertionError(f"Pallas result mismatch vs reference (max err {err:.3e})")
    print("KERNEL_OK")
</pallas_src>

<mosaic_0001>
module attributes {stable_mosaic.version = 11 : i64} {
  func.func @_measure_kernel(%arg0: i32, %arg1: memref<8x16x16xbf16, #tpu.memory_space<vmem>>, %arg2: memref<8x16x16xbf16, #tpu.memory_space<vmem>>, %arg3: memref<16x16xbf16, #tpu.memory_space<vmem>>, %arg4: memref<8x16x1xf32, #tpu.memory_space<vmem>>) attributes {dimension_semantics = [#tpu.dimension_semantics<parallel>], iteration_bounds = array<i64: 2>, scalar_prefetch = 0 : i64, scratch_operands = 0 : i64, tpu.core_type = #tpu.core_type<tc>, window_params = [{transform_indices = @transform_0, window_bounds = array<i64: 8, 16, 16>}, {transform_indices = @transform_1, window_bounds = array<i64: 8, 16, 16>}, {pipeline_mode = #tpu.pipeline_mode<synchronous>, transform_indices = @transform_2, window_bounds = array<i64: 16, 16>}, {transform_indices = @transform_3, window_bounds = array<i64: 8, 16, 1>}]} {
    %c0 = arith.constant 0 : index
    %c0_0 = arith.constant 0 : index
    %c0_1 = arith.constant 0 : index
    %0 = vector.load %arg1[%c0, %c0_0, %c0_1] : memref<8x16x16xbf16, #tpu.memory_space<vmem>>, vector<1x16x16xbf16>
    %1 = vector.shape_cast %0 : vector<1x16x16xbf16> to vector<16x16xbf16>
    %cst = arith.constant -1.000000e+30 : f32
    %2 = vector.broadcast %cst : f32 to vector<16x1xf32>
    %cst_2 = arith.constant 0.000000e+00 : f32
    %3 = vector.broadcast %cst_2 : f32 to vector<16x1xf32>
    %c0_3 = arith.constant 0 : index
    %c0_4 = arith.constant 0 : index
    %c0_5 = arith.constant 0 : index
    %4 = vector.load %arg2[%c0_3, %c0_4, %c0_5] : memref<8x16x16xbf16, #tpu.memory_space<vmem>>, vector<1x16x16xbf16>
    %5 = vector.shape_cast %4 : vector<1x16x16xbf16> to vector<16x16xbf16>
    %cst_6 = arith.constant dense<0.000000e+00> : vector<16x16xf32>
    %6 = tpu.matmul %1, %5, %cst_6 {dimension_numbers = #tpu.dot_dimension_numbers<[1], [1], [0], [0], [0, 0, 1, 0], [], []>} : vector<16x16xbf16>, vector<16x16xbf16>, vector<16x16xf32> -> vector<16x16xf32>
    %c0_7 = arith.constant 0 : index
    %c0_8 = arith.constant 0 : index
    %7 = vector.load %arg3[%c0_7, %c0_8] : memref<16x16xbf16, #tpu.memory_space<vmem>>, vector<16x16xbf16>
    %8 = arith.extf %7 : vector<16x16xbf16> to vector<16x16xf32>
    %cst_9 = arith.constant 0.000000e+00 : f32
    %9 = vector.broadcast %cst_9 : f32 to vector<16x16xf32>
    %10 = arith.cmpf ogt, %8, %9 : vector<16x16xf32>
    %cst_10 = arith.constant -1.000000e+30 : f32
    %11 = vector.broadcast %cst_10 : f32 to vector<16x16xf32>
    %12 = arith.select %10, %6, %11 : vector<16x16xi1>, vector<16x16xf32>
    %cst_11 = arith.constant dense<0xFF800000> : vector<16xf32>
    %13 = vector.multi_reduction <maximumf>, %12, %cst_11 [1] : vector<16x16xf32> to vector<16xf32>
    %14 = vector.shape_cast %13 : vector<16xf32> to vector<16x1xf32>
    %15 = arith.maximumf %2, %14 : vector<16x1xf32>
    %16 = arith.mulf %6, %8 : vector<16x16xf32>
    %cst_12 = arith.constant dense<0.000000e+00> : vector<16xf32>
    %17 = vector.multi_reduction <add>, %16, %cst_12 [1] : vector<16x16xf32> to vector<16xf32>
    %18 = vector.shape_cast %17 : vector<16xf32> to vector<16x1xf32>
    %19 = arith.addf %3, %18 : vector<16x1xf32>
    %cst_13 = arith.constant 6.250000e-02 : f32
    %20 = vector.broadcast %cst_13 : f32 to vector<16x1xf32>
    %21 = arith.mulf %19, %20 : vector<16x1xf32>
    %22 = arith.subf %15, %21 : vector<16x1xf32>
    %c0_14 = arith.constant 0 : index
    %c0_15 = arith.constant 0 : index
    %c0_16 = arith.constant 0 : index
    %23 = vector.load %arg4[%c0_14, %c0_15, %c0_16] : memref<8x16x1xf32, #tpu.memory_space<vmem>>, vector<1x16x1xf32>
    %24 = vector.shape_cast %23 : vector<1x16x1xf32> to vector<16x1xf32>
    %25 = vector.shape_cast %22 : vector<16x1xf32> to vector<1x16x1xf32>
    tpu.vector_store %arg4[%c0_14, %c0_15, %c0_16], %25 {strides = array<i32>} : memref<8x16x1xf32, #tpu.memory_space<vmem>>, vector<1x16x1xf32>,
    %c1 = arith.constant 1 : index
    %c0_17 = arith.constant 0 : index
    %c0_18 = arith.constant 0 : index
    %26 = vector.load %arg1[%c1, %c0_17, %c0_18] : memref<8x16x16xbf16, #tpu.memory_space<vmem>>, vector<1x16x16xbf16>
    %27 = vector.shape_cast %26 : vector<1x16x16xbf16> to vector<16x16xbf16>
    %cst_19 = arith.constant -1.000000e+30 : f32
    %28 = vector.broadcast %cst_19 : f32 to vector<16x1xf32>
    %cst_20 = arith.constant 0.000000e+00 : f32
    %29 = vector.broadcast %cst_20 : f32 to vector<16x1xf32>
    %c1_21 = arith.constant 1 : index
    %c0_22 = arith.constant 0 : index
    %c0_23 = arith.constant 0 : index
    %30 = vector.load %arg2[%c1_21, %c0_22, %c0_23] : memref<8x16x16xbf16, #tpu.memory_space<vmem>>, vector<1x16x16xbf16>
    %31 = vector.shape_cast %30 : vector<1x16x16xbf16> to vector<16x16xbf16>
    %cst_24 = arith.constant dense<0.000000e+00> : vector<16x16xf32>
    %32 = tpu.matmul %27, %31, %cst_24 {dimension_numbers = #tpu.dot_dimension_numbers<[1], [1], [0], [0], [0, 0, 1, 0], [], []>} : vector<16x16xbf16>, vector<16x16xbf16>, vector<16x16xf32> -> vector<16x16xf32>
    %c0_25 = arith.constant 0 : index
    %c0_26 = arith.constant 0 : index
    %33 = vector.load %arg3[%c0_25, %c0_26] : memref<16x16xbf16, #tpu.memory_space<vmem>>, vector<16x16xbf16>
    %34 = arith.extf %33 : vector<16x16xbf16> to vector<16x16xf32>
    %cst_27 = arith.constant 0.000000e+00 : f32
    %35 = vector.broadcast %cst_27 : f32 to vector<16x16xf32>
    %36 = arith.cmpf ogt, %34, %35 : vector<16x16xf32>
    %cst_28 = arith.constant -1.000000e+30 : f32
    %37 = vector.broadcast %cst_28 : f32 to vector<16x16xf32>
    %38 = arith.select %36, %32, %37 : vector<16x16xi1>, vector<16x16xf32>
    %cst_29 = arith.constant dense<0xFF800000> : vector<16xf32>
    %39 = vector.multi_reduction <maximumf>, %38, %cst_29 [1] : vector<16x16xf32> to vector<16xf32>
    %40 = vector.shape_cast %39 : vector<16xf32> to vector<16x1xf32>
    %41 = arith.maximumf %28, %40 : vector<16x1xf32>
    %42 = arith.mulf %32, %34 : vector<16x16xf32>
    %cst_30 = arith.constant dense<0.000000e+00> : vector<16xf32>
    %43 = vector.multi_reduction <add>, %42, %cst_30 [1] : vector<16x16xf32> to vector<16xf32>
    %44 = vector.shape_cast %43 : vector<16xf32> to vector<16x1xf32>
    %45 = arith.addf %29, %44 : vector<16x1xf32>
    %cst_31 = arith.constant 6.250000e-02 : f32
    %46 = vector.broadcast %cst_31 : f32 to vector<16x1xf32>
    %47 = arith.mulf %45, %46 : vector<16x1xf32>
    %48 = arith.subf %41, %47 : vector<16x1xf32>
    %c1_32 = arith.constant 1 : index
    %c0_33 = arith.constant 0 : index
    %c0_34 = arith.constant 0 : index
    %49 = vector.load %arg4[%c1_32, %c0_33, %c0_34] : memref<8x16x1xf32, #tpu.memory_space<vmem>>, vector<1x16x1xf32>
    %50 = vector.shape_cast %49 : vector<1x16x1xf32> to vector<16x1xf32>
    %51 = vector.shape_cast %48 : vector<16x1xf32> to vector<1x16x1xf32>
    tpu.vector_store %arg4[%c1_32, %c0_33, %c0_34], %51 {strides = array<i32>} : memref<8x16x1xf32, #tpu.memory_space<vmem>>, vector<1x16x1xf32>,
    %c2 = arith.constant 2 : index
    %c0_35 = arith.constant 0 : index
    %c0_36 = arith.constant 0 : index
    %52 = vector.load %arg1[%c2, %c0_35, %c0_36] : memref<8x16x16xbf16, #tpu.memory_space<vmem>>, vector<1x16x16xbf16>
    %53 = vector.shape_cast %52 : vector<1x16x16xbf16> to vector<16x16xbf16>
    %cst_37 = arith.constant -1.000000e+30 : f32
    %54 = vector.broadcast %cst_37 : f32 to vector<16x1xf32>
    %cst_38 = arith.constant 0.000000e+00 : f32
    %55 = vector.broadcast %cst_38 : f32 to vector<16x1xf32>
    %c2_39 = arith.constant 2 : index
    %c0_40 = arith.constant 0 : index
    %c0_41 = arith.constant 0 : index
    %56 = vector.load %arg2[%c2_39, %c0_40, %c0_41] : memref<8x16x16xbf16, #tpu.memory_space<vmem>>, vector<1x16x16xbf16>
    %57 = vector.shape_cast %56 : vector<1x16x16xbf16> to vector<16x16xbf16>
    %cst_42 = arith.constant dense<0.000000e+00> : vector<16x16xf32>
    %58 = tpu.matmul %53, %57, %cst_42 {dimension_numbers = #tpu.dot_dimension_numbers<[1], [1], [0], [0], [0, 0, 1, 0], [], []>} : vector<16x16xbf16>, vector<16x16xbf16>, vector<16x16xf32> -> vector<16x16xf32>
    %c0_43 = arith.constant 0 : index
    %c0_44 = arith.constant 0 : index
    %59 = vector.load %arg3[%c0_43, %c0_44] : memref<16x16xbf16, #tpu.memory_space<vmem>>, vector<16x16xbf16>
    %60 = arith.extf %59 : vector<16x16xbf16> to vector<16x16xf32>
    %cst_45 = arith.constant 0.000000e+00 : f32
    %61 = vector.broadcast %cst_45 : f32 to vector<16x16xf32>
    %62 = arith.cmpf ogt, %60, %61 : vector<16x16xf32>
    %cst_46 = arith.constant -1.000000e+30 : f32
    %63 = vector.broadcast %cst_46 : f32 to vector<16x16xf32>
    %64 = arith.select %62, %58, %63 : vector<16x16xi1>, vector<16x16xf32>
    %cst_47 = arith.constant dense<0xFF800000> : vector<16xf32>
    %65 = vector.multi_reduction <maximumf>, %64, %cst_47 [1] : vector<16x16xf32> to vector<16xf32>
    %66 = vector.shape_cast %65 : vector<16xf32> to vector<16x1xf32>
    %67 = arith.maximumf %54, %66 : vector<16x1xf32>
    %68 = arith.mulf %58, %60 : vector<16x16xf32>
    %cst_48 = arith.constant dense<0.000000e+00> : vector<16xf32>
    %69 = vector.multi_reduction <add>, %68, %cst_48 [1] : vector<16x16xf32> to vector<16xf32>
    %70 = vector.shape_cast %69 : vector<16xf32> to vector<16x1xf32>
    %71 = arith.addf %55, %70 : vector<16x1xf32>
    %cst_49 = arith.constant 6.250000e-02 : f32
    %72 = vector.broadcast %cst_49 : f32 to vector<16x1xf32>
    %73 = arith.mulf %71, %72 : vector<16x1xf32>
    %74 = arith.subf %67, %73 : vector<16x1xf32>
    %c2_50 = arith.constant 2 : index
    %c0_51 = arith.constant 0 : index
    %c0_52 = arith.constant 0 : index
    %75 = vector.load %arg4[%c2_50, %c0_51, %c0_52] : memref<8x16x1xf32, #tpu.memory_space<vmem>>, vector<1x16x1xf32>
    %76 = vector.shape_cast %75 : vector<1x16x1xf32> to vector<16x1xf32>
    %77 = vector.shape_cast %74 : vector<16x1xf32> to vector<1x16x1xf32>
    tpu.vector_store %arg4[%c2_50, %c0_51, %c0_52], %77 {strides = array<i32>} : memref<8x16x1xf32, #tpu.memory_space<vmem>>, vector<1x16x1xf32>,
    %c3 = arith.constant 3 : index
    %c0_53 = arith.constant 0 : index
    %c0_54 = arith.constant 0 : index
    %78 = vector.load %arg1[%c3, %c0_53, %c0_54] : memref<8x16x16xbf16, #tpu.memory_space<vmem>>, vector<1x16x16xbf16>
    %79 = vector.shape_cast %78 : vector<1x16x16xbf16> to vector<16x16xbf16>
    %cst_55 = arith.constant -1.000000e+30 : f32
    %80 = vector.broadcast %cst_55 : f32 to vector<16x1xf32>
    %cst_56 = arith.constant 0.000000e+00 : f32
    %81 = vector.broadcast %cst_56 : f32 to vector<16x1xf32>
    %c3_57 = arith.constant 3 : index
    %c0_58 = arith.constant 0 : index
    %c0_59 = arith.constant 0 : index
    %82 = vector.load %arg2[%c3_57, %c0_58, %c0_59] : memref<8x16x16xbf16, #tpu.memory_space<vmem>>, vector<1x16x16xbf16>
    %83 = vector.shape_cast %82 : vector<1x16x16xbf16> to vector<16x16xbf16>
    %cst_60 = arith.constant dense<0.000000e+00> : vector<16x16xf32>
    %84 = tpu.matmul %79, %83, %cst_60 {dimension_numbers = #tpu.dot_dimension_numbers<[1], [1], [0], [0], [0, 0, 1, 0], [], []>} : vector<16x16xbf16>, vector<16x16xbf16>, vector<16x16xf32> -> vector<16x16xf32>
    %c0_61 = arith.constant 0 : index
    %c0_62 = arith.constant 0 : index
    %85 = vector.load %arg3[%c0_61, %c0_62] : memref<16x16xbf16, #tpu.memory_space<vmem>>, vector<16x16xbf16>
    %86 = arith.extf %85 : vector<16x16xbf16> to vector<16x16xf32>
    %cst_63 = arith.constant 0.000000e+00 : f32
    %87 = vector.broadcast %cst_63 : f32 to vector<16x16xf32>
    %88 = arith.cmpf ogt, %86, %87 : vector<16x16xf32>
    %cst_64 = arith.constant -1.000000e+30 : f32
    %89 = vector.broadcast %cst_64 : f32 to vector<16x16xf32>
    %90 = arith.select %88, %84, %89 : vector<16x16xi1>, vector<16x16xf32>
    %cst_65 = arith.constant dense<0xFF800000> : vector<16xf32>
    %91 = vector.multi_reduction <maximumf>, %90, %cst_65 [1] : vector<16x16xf32> to vector<16xf32>
    %92 = vector.shape_cast %91 : vector<16xf32> to vector<16x1xf32>
    %93 = arith.maximumf %80, %92 : vector<16x1xf32>
    %94 = arith.mulf %84, %86 : vector<16x16xf32>
    %cst_66 = arith.constant dense<0.000000e+00> : vector<16xf32>
    %95 = vector.multi_reduction <add>, %94, %cst_66 [1] : vector<16x16xf32> to vector<16xf32>
    %96 = vector.shape_cast %95 : vector<16xf32> to vector<16x1xf32>
    %97 = arith.addf %81, %96 : vector<16x1xf32>
    %cst_67 = arith.constant 6.250000e-02 : f32
    %98 = vector.broadcast %cst_67 : f32 to vector<16x1xf32>
    %99 = arith.mulf %97, %98 : vector<16x1xf32>
    %100 = arith.subf %93, %99 : vector<16x1xf32>
    %c3_68 = arith.constant 3 : index
    %c0_69 = arith.constant 0 : index
    %c0_70 = arith.constant 0 : index
    %101 = vector.load %arg4[%c3_68, %c0_69, %c0_70] : memref<8x16x1xf32, #tpu.memory_space<vmem>>, vector<1x16x1xf32>
    %102 = vector.shape_cast %101 : vector<1x16x1xf32> to vector<16x1xf32>
    %103 = vector.shape_cast %100 : vector<16x1xf32> to vector<1x16x1xf32>
    tpu.vector_store %arg4[%c3_68, %c0_69, %c0_70], %103 {strides = array<i32>} : memref<8x16x1xf32, #tpu.memory_space<vmem>>, vector<1x16x1xf32>,
    %c4 = arith.constant 4 : index
    %c0_71 = arith.constant 0 : index
    %c0_72 = arith.constant 0 : index
    %104 = vector.load %arg1[%c4, %c0_71, %c0_72] : memref<8x16x16xbf16, #tpu.memory_space<vmem>>, vector<1x16x16xbf16>
    %105 = vector.shape_cast %104 : vector<1x16x16xbf16> to vector<16x16xbf16>
    %cst_73 = arith.constant -1.000000e+30 : f32
    %106 = vector.broadcast %cst_73 : f32 to vector<16x1xf32>
    %cst_74 = arith.constant 0.000000e+00 : f32
    %107 = vector.broadcast %cst_74 : f32 to vector<16x1xf32>
    %c4_75 = arith.constant 4 : index
    %c0_76 = arith.constant 0 : index
    %c0_77 = arith.constant 0 : index
    %108 = vector.load %arg2[%c4_75, %c0_76, %c0_77] : memref<8x16x16xbf16, #tpu.memory_space<vmem>>, vector<1x16x16xbf16>
    %109 = vector.shape_cast %108 : vector<1x16x16xbf16> to vector<16x16xbf16>
    %cst_78 = arith.constant dense<0.000000e+00> : vector<16x16xf32>
    %110 = tpu.matmul %105, %109, %cst_78 {dimension_numbers = #tpu.dot_dimension_numbers<[1], [1], [0], [0], [0, 0, 1, 0], [], []>} : vector<16x16xbf16>, vector<16x16xbf16>, vector<16x16xf32> -> vector<16x16xf32>
    %c0_79 = arith.constant 0 : index
    %c0_80 = arith.constant 0 : index
    %111 = vector.load %arg3[%c0_79, %c0_80] : memref<16x16xbf16, #tpu.memory_space<vmem>>, vector<16x16xbf16>
    %112 = arith.extf %111 : vector<16x16xbf16> to vector<16x16xf32>
    %cst_81 = arith.constant 0.000000e+00 : f32
    %113 = vector.broadcast %cst_81 : f32 to vector<16x16xf32>
    %114 = arith.cmpf ogt, %112, %113 : vector<16x16xf32>
    %cst_82 = arith.constant -1.000000e+30 : f32
    %115 = vector.broadcast %cst_82 : f32 to vector<16x16xf32>
    %116 = arith.select %114, %110, %115 : vector<16x16xi1>, vector<16x16xf32>
    %cst_83 = arith.constant dense<0xFF800000> : vector<16xf32>
    %117 = vector.multi_reduction <maximumf>, %116, %cst_83 [1] : vector<16x16xf32> to vector<16xf32>
    %118 = vector.shape_cast %117 : vector<16xf32> to vector<16x1xf32>
    %119 = arith.maximumf %106, %118 : vector<16x1xf32>
    %120 = arith.mulf %110, %112 : vector<16x16xf32>
    %cst_84 = arith.constant dense<0.000000e+00> : vector<16xf32>
    %121 = vector.multi_reduction <add>, %120, %cst_84 [1] : vector<16x16xf32> to vector<16xf32>
    %122 = vector.shape_cast %121 : vector<16xf32> to vector<16x1xf32>
    %123 = arith.addf %107, %122 : vector<16x1xf32>
    %cst_85 = arith.constant 6.250000e-02 : f32
    %124 = vector.broadcast %cst_85 : f32 to vector<16x1xf32>
    %125 = arith.mulf %123, %124 : vector<16x1xf32>
    %126 = arith.subf %119, %125 : vector<16x1xf32>
    %c4_86 = arith.constant 4 : index
    %c0_87 = arith.constant 0 : index
    %c0_88 = arith.constant 0 : index
    %127 = vector.load %arg4[%c4_86, %c0_87, %c0_88] : memref<8x16x1xf32, #tpu.memory_space<vmem>>, vector<1x16x1xf32>
    %128 = vector.shape_cast %127 : vector<1x16x1xf32> to vector<16x1xf32>
    %129 = vector.shape_cast %126 : vector<16x1xf32> to vector<1x16x1xf32>
    tpu.vector_store %arg4[%c4_86, %c0_87, %c0_88], %129 {strides = array<i32>} : memref<8x16x1xf32, #tpu.memory_space<vmem>>, vector<1x16x1xf32>,
    %c5 = arith.constant 5 : index
    %c0_89 = arith.constant 0 : index
    %c0_90 = arith.constant 0 : index
    %130 = vector.load %arg1[%c5, %c0_89, %c0_90] : memref<8x16x16xbf16, #tpu.memory_space<vmem>>, vector<1x16x16xbf16>
    %131 = vector.shape_cast %130 : vector<1x16x16xbf16> to vector<16x16xbf16>
    %cst_91 = arith.constant -1.000000e+30 : f32
    %132 = vector.broadcast %cst_91 : f32 to vector<16x1xf32>
    %cst_92 = arith.constant 0.000000e+00 : f32
    %133 = vector.broadcast %cst_92 : f32 to vector<16x1xf32>
    %c5_93 = arith.constant 5 : index
    %c0_94 = arith.constant 0 : index
    %c0_95 = arith.constant 0 : index
    %134 = vector.load %arg2[%c5_93, %c0_94, %c0_95] : memref<8x16x16xbf16, #tpu.memory_space<vmem>>, vector<1x16x16xbf16>
    %135 = vector.shape_cast %134 : vector<1x16x16xbf16> to vector<16x16xbf16>
    %cst_96 = arith.constant dense<0.000000e+00> : vector<16x16xf32>
    %136 = tpu.matmul %131, %135, %cst_96 {dimension_numbers = #tpu.dot_dimension_numbers<[1], [1], [0], [0], [0, 0, 1, 0], [], []>} : vector<16x16xbf16>, vector<16x16xbf16>, vector<16x16xf32> -> vector<16x16xf32>
    %c0_97 = arith.constant 0 : index
    %c0_98 = arith.constant 0 : index
    %137 = vector.load %arg3[%c0_97, %c0_98] : memref<16x16xbf16, #tpu.memory_space<vmem>>, vector<16x16xbf16>
    %138 = arith.extf %137 : vector<16x16xbf16> to vector<16x16xf32>
    %cst_99 = arith.constant 0.000000e+00 : f32
    %139 = vector.broadcast %cst_99 : f32 to vector<16x16xf32>
    %140 = arith.cmpf ogt, %138, %139 : vector<16x16xf32>
    %cst_100 = arith.constant -1.000000e+30 : f32
    %141 = vector.broadcast %cst_100 : f32 to vector<16x16xf32>
    %142 = arith.select %140, %136, %141 : vector<16x16xi1>, vector<16x16xf32>
    %cst_101 = arith.constant dense<0xFF800000> : vector<16xf32>
    %143 = vector.multi_reduction <maximumf>, %142, %cst_101 [1] : vector<16x16xf32> to vector<16xf32>
    %144 = vector.shape_cast %143 : vector<16xf32> to vector<16x1xf32>
    %145 = arith.maximumf %132, %144 : vector<16x1xf32>
    %146 = arith.mulf %136, %138 : vector<16x16xf32>
    %cst_102 = arith.constant dense<0.000000e+00> : vector<16xf32>
    %147 = vector.multi_reduction <add>, %146, %cst_102 [1] : vector<16x16xf32> to vector<16xf32>
    %148 = vector.shape_cast %147 : vector<16xf32> to vector<16x1xf32>
    %149 = arith.addf %133, %148 : vector<16x1xf32>
    %cst_103 = arith.constant 6.250000e-02 : f32
    %150 = vector.broadcast %cst_103 : f32 to vector<16x1xf32>
    %151 = arith.mulf %149, %150 : vector<16x1xf32>
    %152 = arith.subf %145, %151 : vector<16x1xf32>
    %c5_104 = arith.constant 5 : index
    %c0_105 = arith.constant 0 : index
    %c0_106 = arith.constant 0 : index
    %153 = vector.load %arg4[%c5_104, %c0_105, %c0_106] : memref<8x16x1xf32, #tpu.memory_space<vmem>>, vector<1x16x1xf32>
    %154 = vector.shape_cast %153 : vector<1x16x1xf32> to vector<16x1xf32>
    %155 = vector.shape_cast %152 : vector<16x1xf32> to vector<1x16x1xf32>
    tpu.vector_store %arg4[%c5_104, %c0_105, %c0_106], %155 {strides = array<i32>} : memref<8x16x1xf32, #tpu.memory_space<vmem>>, vector<1x16x1xf32>,
    %c6 = arith.constant 6 : index
    %c0_107 = arith.constant 0 : index
    %c0_108 = arith.constant 0 : index
    %156 = vector.load %arg1[%c6, %c0_107, %c0_108] : memref<8x16x16xbf16, #tpu.memory_space<vmem>>, vector<1x16x16xbf16>
    %157 = vector.shape_cast %156 : vector<1x16x16xbf16> to vector<16x16xbf16>
    %cst_109 = arith.constant -1.000000e+30 : f32
    %158 = vector.broadcast %cst_109 : f32 to vector<16x1xf32>
    %cst_110 = arith.constant 0.000000e+00 : f32
    %159 = vector.broadcast %cst_110 : f32 to vector<16x1xf32>
    %c6_111 = arith.constant 6 : index
    %c0_112 = arith.constant 0 : index
    %c0_113 = arith.constant 0 : index
    %160 = vector.load %arg2[%c6_111, %c0_112, %c0_113] : memref<8x16x16xbf16, #tpu.memory_space<vmem>>, vector<1x16x16xbf16>
    %161 = vector.shape_cast %160 : vector<1x16x16xbf16> to vector<16x16xbf16>
    %cst_114 = arith.constant dense<0.000000e+00> : vector<16x16xf32>
    %162 = tpu.matmul %157, %161, %cst_114 {dimension_numbers = #tpu.dot_dimension_numbers<[1], [1], [0], [0], [0, 0, 1, 0], [], []>} : vector<16x16xbf16>, vector<16x16xbf16>, vector<16x16xf32> -> vector<16x16xf32>
    %c0_115 = arith.constant 0 : index
    %c0_116 = arith.constant 0 : index
    %163 = vector.load %arg3[%c0_115, %c0_116] : memref<16x16xbf16, #tpu.memory_space<vmem>>, vector<16x16xbf16>
    %164 = arith.extf %163 : vector<16x16xbf16> to vector<16x16xf32>
    %cst_117 = arith.constant 0.000000e+00 : f32
    %165 = vector.broadcast %cst_117 : f32 to vector<16x16xf32>
    %166 = arith.cmpf ogt, %164, %165 : vector<16x16xf32>
    %cst_118 = arith.constant -1.000000e+30 : f32
    %167 = vector.broadcast %cst_118 : f32 to vector<16x16xf32>
    %168 = arith.select %166, %162, %167 : vector<16x16xi1>, vector<16x16xf32>
    %cst_119 = arith.constant dense<0xFF800000> : vector<16xf32>
    %169 = vector.multi_reduction <maximumf>, %168, %cst_119 [1] : vector<16x16xf32> to vector<16xf32>
    %170 = vector.shape_cast %169 : vector<16xf32> to vector<16x1xf32>
    %171 = arith.maximumf %158, %170 : vector<16x1xf32>
    %172 = arith.mulf %162, %164 : vector<16x16xf32>
    %cst_120 = arith.constant dense<0.000000e+00> : vector<16xf32>
    %173 = vector.multi_reduction <add>, %172, %cst_120 [1] : vector<16x16xf32> to vector<16xf32>
    %174 = vector.shape_cast %173 : vector<16xf32> to vector<16x1xf32>
    %175 = arith.addf %159, %174 : vector<16x1xf32>
    %cst_121 = arith.constant 6.250000e-02 : f32
    %176 = vector.broadcast %cst_121 : f32 to vector<16x1xf32>
    %177 = arith.mulf %175, %176 : vector<16x1xf32>
    %178 = arith.subf %171, %177 : vector<16x1xf32>
    %c6_122 = arith.constant 6 : index
    %c0_123 = arith.constant 0 : index
    %c0_124 = arith.constant 0 : index
    %179 = vector.load %arg4[%c6_122, %c0_123, %c0_124] : memref<8x16x1xf32, #tpu.memory_space<vmem>>, vector<1x16x1xf32>
    %180 = vector.shape_cast %179 : vector<1x16x1xf32> to vector<16x1xf32>
    %181 = vector.shape_cast %178 : vector<16x1xf32> to vector<1x16x1xf32>
    tpu.vector_store %arg4[%c6_122, %c0_123, %c0_124], %181 {strides = array<i32>} : memref<8x16x1xf32, #tpu.memory_space<vmem>>, vector<1x16x1xf32>,
    %c7 = arith.constant 7 : index
    %c0_125 = arith.constant 0 : index
    %c0_126 = arith.constant 0 : index
    %182 = vector.load %arg1[%c7, %c0_125, %c0_126] : memref<8x16x16xbf16, #tpu.memory_space<vmem>>, vector<1x16x16xbf16>
    %183 = vector.shape_cast %182 : vector<1x16x16xbf16> to vector<16x16xbf16>
    %cst_127 = arith.constant -1.000000e+30 : f32
    %184 = vector.broadcast %cst_127 : f32 to vector<16x1xf32>
    %cst_128 = arith.constant 0.000000e+00 : f32
    %185 = vector.broadcast %cst_128 : f32 to vector<16x1xf32>
    %c7_129 = arith.constant 7 : index
    %c0_130 = arith.constant 0 : index
    %c0_131 = arith.constant 0 : index
    %186 = vector.load %arg2[%c7_129, %c0_130, %c0_131] : memref<8x16x16xbf16, #tpu.memory_space<vmem>>, vector<1x16x16xbf16>
    %187 = vector.shape_cast %186 : vector<1x16x16xbf16> to vector<16x16xbf16>
    %cst_132 = arith.constant dense<0.000000e+00> : vector<16x16xf32>
    %188 = tpu.matmul %183, %187, %cst_132 {dimension_numbers = #tpu.dot_dimension_numbers<[1], [1], [0], [0], [0, 0, 1, 0], [], []>} : vector<16x16xbf16>, vector<16x16xbf16>, vector<16x16xf32> -> vector<16x16xf32>
    %c0_133 = arith.constant 0 : index
    %c0_134 = arith.constant 0 : index
    %189 = vector.load %arg3[%c0_133, %c0_134] : memref<16x16xbf16, #tpu.memory_space<vmem>>, vector<16x16xbf16>
    %190 = arith.extf %189 : vector<16x16xbf16> to vector<16x16xf32>
    %cst_135 = arith.constant 0.000000e+00 : f32
    %191 = vector.broadcast %cst_135 : f32 to vector<16x16xf32>
    %192 = arith.cmpf ogt, %190, %191 : vector<16x16xf32>
    %cst_136 = arith.constant -1.000000e+30 : f32
    %193 = vector.broadcast %cst_136 : f32 to vector<16x16xf32>
    %194 = arith.select %192, %188, %193 : vector<16x16xi1>, vector<16x16xf32>
    %cst_137 = arith.constant dense<0xFF800000> : vector<16xf32>
    %195 = vector.multi_reduction <maximumf>, %194, %cst_137 [1] : vector<16x16xf32> to vector<16xf32>
    %196 = vector.shape_cast %195 : vector<16xf32> to vector<16x1xf32>
    %197 = arith.maximumf %184, %196 : vector<16x1xf32>
    %198 = arith.mulf %188, %190 : vector<16x16xf32>
    %cst_138 = arith.constant dense<0.000000e+00> : vector<16xf32>
    %199 = vector.multi_reduction <add>, %198, %cst_138 [1] : vector<16x16xf32> to vector<16xf32>
    %200 = vector.shape_cast %199 : vector<16xf32> to vector<16x1xf32>
    %201 = arith.addf %185, %200 : vector<16x1xf32>
    %cst_139 = arith.constant 6.250000e-02 : f32
    %202 = vector.broadcast %cst_139 : f32 to vector<16x1xf32>
    %203 = arith.mulf %201, %202 : vector<16x1xf32>
    %204 = arith.subf %197, %203 : vector<16x1xf32>
    %c7_140 = arith.constant 7 : index
    %c0_141 = arith.constant 0 : index
    %c0_142 = arith.constant 0 : index
    %205 = vector.load %arg4[%c7_140, %c0_141, %c0_142] : memref<8x16x1xf32, #tpu.memory_space<vmem>>, vector<1x16x1xf32>
    %206 = vector.shape_cast %205 : vector<1x16x1xf32> to vector<16x1xf32>
    %207 = vector.shape_cast %204 : vector<16x1xf32> to vector<1x16x1xf32>
    tpu.vector_store %arg4[%c7_140, %c0_141, %c0_142], %207 {strides = array<i32>} : memref<8x16x1xf32, #tpu.memory_space<vmem>>, vector<1x16x1xf32>,
    return
  }
  func.func @transform_0(%arg0: i32) -> (i32, i32, i32) {
    %c0_i32 = arith.constant 0 : i32
    %c0_i32_0 = arith.constant 0 : i32
    %c0_i32_1 = arith.constant 0 : i32
    return %arg0, %c0_i32, %c0_i32_0 : i32, i32, i32
  }
  func.func @transform_1(%arg0: i32) -> (i32, i32, i32) {
    %c0_i32 = arith.constant 0 : i32
    %c0_i32_0 = arith.constant 0 : i32
    %c0_i32_1 = arith.constant 0 : i32
    return %arg0, %c0_i32, %c0_i32_0 : i32, i32, i32
  }
  func.func @transform_2(%arg0: i32) -> (i32, i32) {
    %c0_i32 = arith.constant 0 : i32
    %c0_i32_0 = arith.constant 0 : i32
    %c0_i32_1 = arith.constant 0 : i32
    return %c0_i32, %c0_i32_0 : i32, i32
  }
  func.func @transform_3(%arg0: i32) -> (i32, i32, i32) {
    %c0_i32 = arith.constant 0 : i32
    %c0_i32_0 = arith.constant 0 : i32
    %c0_i32_1 = arith.constant 0 : i32
    return %arg0, %c0_i32, %c0_i32_0 : i32, i32, i32
  }
}

</mosaic_0001>

<bundles_post_ra>
// kernel: tpu_custom_call.1
= control target key start
LH: loop header
LB: loop body
LE: loop exit
PB: predicated region body
PF: predicated region fallthrough
CT: control target
= control target key end

     0   :  { %8 = vsyncpa [#allocation3], 0  ;;  %s1598_s0 = inlined_call_operand.hbm [shape: bf16[16,16,16], index: 0, kind: input, shape index: {}]   ;;  %s1599_s1 = inlined_call_operand.hbm [shape: bf16[16,16,16], index: 1, kind: input, shape index: {}]   ;;  %s1600_s2 = inlined_call_operand.hbm [shape: bf16[16,16], index: 2, kind: input, shape index: {}]   ;;  %s1601_s3 = inlined_call_operand.vmem [shape: f32[16,16,1], index: 3, kind: output, shape index: {}]  }
   0x1   :  { %10 = vsyncpa [#allocation3 + $0x1], 0 }
   0x2   :  { %11 = vsyncpa [#allocation5], 0 }
   0x3   :  { %13 = vsyncpa [#allocation5 + $0x1], 0  ;;  %s1314_s12 = smov 0   ;;  %s1316_s13 = smov 0  }
   0x4   :  { %s1318_s14 = smov 0   ;;  %s1320_s15 = smov 0  }
   0x5 LB: > { %s1333_s16 = sadd.s32 4294967295, %s1289_s15   ;;  %p39_p0 = scmp.ne.s32.totalorder %s1281_s13, %s1277_s12  ;;  %s1289_s15 = sphi %s1320_s15, %s1608_s15   ;;  %s1285_s14 = sphi %s1318_s14, %s1607_s14   ;;  %s1281_s13 = sphi %s1316_s13, %s1606_s13   ;;  %s1277_s12 = sphi %s1314_s12, %s1605_s12  }
   0x6   : > { %p40_p1 = scmp.eq.s32.totalorder %s1333_s16, 0  ;;  %p913_p2 = scmp.ge.s32.totalorder %s1289_s15, 1 }
   0x7   : > { %p123_p3 = scmp.lt.s32.totalorder %s1289_s15, 3  ;;  %s134_s20 = sshll.u32 %s1600_s2, 4  ;;  %s135_s20 = int_to_ptr.hbm [resolvable:$true] %s134_s20 }
   0x8   : > { %p1341_p4 = por %p40_p1, %p39_p0  ;;  %s1291_s22 = smov [#allocation6]  }
   0x9   : > { %p1348_p5 = pnand %p913_p2, %p123_p3  ;;  %s136_s23 = sshll.u32 %s1291_s22, 4  ;;  %s137_s23 = int_to_ptr.vmem [resolvable:$true] %s136_s23 }
   0xa   : > { %s1357_s24 = sadd.s32 1, %s1289_s15   ;;  %s1292_s25 = smov 64  }
   0xb   : > { %p1108_p6 = pneg %p1348_p5  ;;  %s1293_s26 = smov 4  }
   0xc   : > { %s23_s27 = ssub.s32 %s1289_s15, %s1357_s24  ;;  %s26_s28 = sadd.s32 1, %s1285_s14 }
   0xd   : > { %p1109_p7 = pnand %p1108_p6, %p40_p1  ;;  %p24_p8 = scmp.eq.s32.totalorder %s23_s27, 0 }
   0xe   : > { %p33_p9 = scmp.ne.s32.totalorder %s1285_s14, %s1281_s13  ;;  %p34_p10 = scmp.eq.s32.totalorder %s1289_s15, 0 }
   0xf   : > { %1111 = dma.hbm_to_vmem [thread:$0]  (!%p1109_p7), %s135_s20, 128, %s137_s23, [#allocation5], %s1292_s25, %s1292_s25, %s1293_s26  }
  0x10   : > { %p1120_p11 = scmp.lt.s32.totalorder %s1289_s15, 2  ;;  %p35_p12 = por %p34_p10, %p33_p9 }
  0x11   : > { %s1370_s29 = scalar_select %p24_p8, %s1285_s14, %s26_s28  }
  0x12   : > { %s150_s30 = sand.u32 1, %s1285_s14   ;;  %s1048_s5 = sshll.u32 %s1289_s15, 6 }
  0x13   : > { %s1373_s4 = sshll.u32 %s150_s30, 6  ;;  %s160_s8 = scalar_lea.hbm %s1598_s0, %s1048_s5 }
  0x14   : > { %s154_s9 = scalar_lea.vmem [#allocation2], %s1373_s4  ;;  %s161_s11 = sshll.u32 %s160_s8, 4  ;;  %s162_s11 = int_to_ptr.hbm [resolvable:$true] %s161_s11 }
  0x15   : > { %s163_s10 = sshll.u32 %s154_s9, 4  ;;  %p1380_p13 = pnand %p1120_p11, %p35_p12  ;;  %s164_s10 = int_to_ptr.vmem [resolvable:$true] %s163_s10 }
  0x16   : > { %s183_s20 = scalar_lea.hbm %s1599_s1, %s1048_s5  ;;  %s151_s23 = scalar_lea.sflag [#allocation3], %s150_s30 }
  0x17   : > { %s184_s22 = sshll.u32 %s183_s20, 4  ;;  %s1187_s27 = sshra.s32 %s162_s11, 4  ;;  %s1188_s27 = int_to_ptr.hbm [resolvable:$true] %s1187_s27  ;;  %s185_s22 = int_to_ptr.hbm [resolvable:$true] %s184_s22 }
  0x18   : > { %s1189_s28 = scalar_lea.hbm %s1188_s27, 64  ;;  %p1191_p2 = pneg %p1380_p13 }
  0x19   : > { %p1190_p0 = scmp.ne.s32.totalorder %s1188_s27, %s1189_s28  ;;  %s1194_s8 = scalar_lea.hbm %s1598_s0, 128 }
  0x1a   : > { %p1195_p7 = scmp.lt.s32.totalorder %s1188_s27, %s1598_s0  ;;  %p1196_p8 = scmp.lt.s32.totalorder %s1194_s8, %s1189_s28 }
  0x1b   : > { %p1192_p3 = pnand %p1191_p2, %p1190_p0 }
  0x1c   : > { %p1197_p9 = por %p1196_p8, %p1195_p7 }
  0x1d   : > { %p1193_p6 = pneg %p1192_p3 }
  0x1f   : > { %p1198_p10 = pnand %p1197_p9, %p1193_p6 }
  0x21   : > { %1201 = shalt.err (!%p1198_p10)
}
  0x22   : > { %1115 = dma.hbm_to_vmem [thread:$0]  (!%p1380_p13), %s162_s11, 1024, %s164_s10, %s151_s23, %s1292_s25, %s1292_s25, %s1293_s26  }
  0x23   : > { %s177_s30 = scalar_lea.vmem [#allocation4], %s1373_s4  ;;  %s173_s19 = sand.u32 1, %s1289_s15  }
  0x24   : > { %s186_s5 = sshll.u32 %s177_s30, 4  ;;  %s174_s20 = scalar_lea.sflag [#allocation5], %s173_s19  ;;  %s187_s5 = int_to_ptr.vmem [resolvable:$true] %s186_s5 }
  0x25   : > { %s1217_s27 = sshra.s32 %s185_s22, 4  ;;  %s1224_s8 = scalar_lea.hbm %s1599_s1, 128  ;;  %s1218_s27 = int_to_ptr.hbm [resolvable:$true] %s1217_s27 }
  0x26   : > { %s1219_s28 = scalar_lea.hbm %s1218_s27, 64  ;;  %p1225_p3 = scmp.lt.s32.totalorder %s1218_s27, %s1599_s1 }
  0x27   : > { %p1220_p11 = scmp.ne.s32.totalorder %s1218_s27, %s1219_s28  ;;  %p1226_p6 = scmp.lt.s32.totalorder %s1224_s8, %s1219_s28 }
  0x29   : > { %p1222_p12 = pnand %p1220_p11, %p1191_p2  ;;  %p1227_p7 = por %p1226_p6, %p1225_p3 }
  0x2b   : > { %p1223_p0 = pneg %p1222_p12 }
  0x2d   : > { %p1228_p8 = pnand %p1227_p7, %p1223_p0 }
  0x2f   : > { %1231 = shalt.err (!%p1228_p8)
}
  0x30   : > { %1118 = dma.hbm_to_vmem [thread:$0]  (!%p1380_p13), %s185_s22, 1024, %s187_s5, %s174_s20, %s1292_s25, %s1292_s25, %s1293_s26  }
  0x31   : > { %198 = sbr.rel (%p1348_p5) target bundleno = 400 (0x190), region = 32  ;;  %s200_s15 = sand.u32 (!%p1348_p5), 1, %s1281_s13  }
  0x32   : > { %s925_s4 = sshll.u32 (!%p1348_p5), %s200_s15, 6  ;;  %s201_s11 = scalar_lea.sflag (!%p1348_p5), [#allocation3], %s200_s15 }
  0x33   : > { %s1422_s23 = scalar_lea.vmem (!%p1348_p5), [#allocation2], %s925_s4 }
  0x36   : > { %1264 = dma.done.wait (%p1341_p4), %s201_s11, 1024  }
  0x37   : > { %1266 = vsyncadd (%p1341_p4), %s201_s11, 4294966272  ;;  %s210_s12 = sand.u32 1, %s1333_s16   ;;  %s214_s25 = scalar_lea.vmem [#allocation4], %s925_s4 }
  0x38   : > { %s211_s18 = scalar_lea.sflag [#allocation5], %s210_s12 }
  0x39   : > { %1268 = dma.done.wait (%p1341_p4), %s211_s18, 1024  }
  0x3a   : > { %1270 = vsyncadd (%p1341_p4), %s211_s18, 4294966272 }
  0x3b   : > { %1272 = dma.done.wait (%p40_p1), [#allocation5], 128  }
  0x3c   : > { %1274 = vsyncadd (%p40_p1), [#allocation5], 4294967168  ;;  %vm273_vm0 = vcmask 130048   ;;  %v1053_v0 = vld [vmem:[%s214_s25] sm:$0xff]  ;;  %v1055_v1 = vld [vmem:[%s214_s25 + $0x8] sm:$0xff]  ;;  %s928_s17 = sshll.u32 %s1333_s16, 3 }
  0x3d   : > { %v1057_v2 = vld [vmem:[%s214_s25 + $0x10] sm:$0xff]  ;;  %v1059_v3 = vld [vmem:[%s214_s25 + $0x18] sm:$0xff]  ;;  %v278_v4 = vsel %vm273_vm0, %v1053_v0, 0  ;;  %v347_v5 = vsel %vm273_vm0, %v1055_v1, 0  ;;  %v1061_v7 = vld [vmem:[%s214_s25 + $0x20] sm:$0xff]  ;;  %p252_p1 = scmp.lt.s32.totalorder %s928_s17, 15 }
  0x3e   : > { %v416_v6 = vsel %vm273_vm0, %v1057_v2, 0  ;;  %287 = vmatpush.bf16.xpose.msra.mxu0 %v278_v4  ;;  %356 = vmatpush.bf16.xpose.msra.mxu1 %v347_v5  ;;  %v485_v8 = vsel %vm273_vm0, %v1059_v3, 0  ;;  %v1063_v9 = vld [vmem:[%s214_s25 + $0x28] sm:$0xff]  ;;  %v1065_v10 = vld [vmem:[%s214_s25 + $0x30] sm:$0xff]  ;;  %v554_v11 = vsel %vm273_vm0, %v1061_v7, 0  ;;  %v1067_v12 = vld [vmem:[%s214_s25 + $0x38] sm:$0xff] }
  0x3f   : > { %425 = vmatpush.bf16.xpose.msra.mxu2 %v416_v6  ;;  %494 = vmatpush.bf16.xpose.msra.mxu3 %v485_v8  ;;  %v623_v13 = vsel %vm273_vm0, %v1063_v9, 0  ;;  %v692_v14 = vsel %vm273_vm0, %v1065_v10, 0  ;;  %v1052_v15 = vld [vmem:[%s1422_s23] sm:$0xff]  ;;  %v1054_v16 = vld [vmem:[%s1422_s23 + $0x8] sm:$0xff]  ;;  %v761_v17 = vsel %vm273_vm0, %v1067_v12, 0  ;;  %v1056_v18 = vld [vmem:[%s1422_s23 + $0x10] sm:$0xff] }
  0x40   : > { %v1058_v19 = vld [vmem:[%s1422_s23 + $0x18] sm:$0xff]  ;;  %v1060_v20 = vld [vmem:[%s1422_s23 + $0x20] sm:$0xff]  ;;  %v1062_v21 = vld [vmem:[%s1422_s23 + $0x28] sm:$0xff]  ;;  %s1610_s17 = smov (!%p252_p1, %s928_s17), 15  ;;  %vm324_vm3 = vcmask 7168  }
  0x41   : > { %v1064_v22 = vld [vmem:[%s1422_s23 + $0x30] sm:$0xff]  ;;  %v1066_v23 = vld [vmem:[%s1422_s23 + $0x38] sm:$0xff]  ;;  %v1073_v24 = vld [vmem:[#allocation6] sm:$0xff]   ;;  %s1051_s21 = sshll.u32 %s1610_s17, 4 }
  0x42   : > { %v1461_v25 = vunpack.c.l.bf16 %v1073_v24  ;;  %v1479_v41 = vunpack.c.h.bf16 %v1073_v24  ;;  %s1551_s30 = scalar_lea.vmem %s1601_s3, %s1051_s21 }
  0x44   : > { %vm367_vm1 = vcmp.gt.f32.partialorder %v1461_v25, 0.0  ;;  %vm368_vm2 = vcmp.gt.f32.partialorder %v1479_v41, 0.0 }
  0x45   : > { %939 = vmatmul.msk.bf16.vlgmr.msra.gmra.mxu0 %vm273_vm0, %v1052_v15  ;;  %952 = vmatmul.msk.bf16.vlgmr.msra.gmra.mxu1 %vm273_vm0, %v1054_v16 }
  0x46   : > { %563 = vmatpush.bf16.xpose.msrb.mxu0 %v554_v11  ;;  %632 = vmatpush.bf16.xpose.msrb.mxu1 %v623_v13 }
  0x47   : > { %701 = vmatpush.bf16.xpose.msrb.mxu2 %v692_v14  ;;  %770 = vmatpush.bf16.xpose.msrb.mxu3 %v761_v17 }
  0x48   : > { %967 = vmatmul.msk.bf16.vlgmr.msra.gmra.mxu2 %vm273_vm0, %v1056_v18  ;;  %982 = vmatmul.msk.bf16.vlgmr.msra.gmra.mxu3 %vm273_vm0, %v1058_v19 }
  0x55   : > { %997 = vmatmul.msk.bf16.vlgmr.msrb.gmra.mxu0 %vm273_vm0, %v1060_v20  ;;  %1012 = vmatmul.msk.bf16.vlgmr.msrb.gmra.mxu1 %vm273_vm0, %v1062_v21 }
  0x58   : > { %1027 = vmatmul.msk.bf16.vlgmr.msrb.gmra.mxu2 %vm273_vm0, %v1064_v22  ;;  %1042 = vmatmul.msk.bf16.vlgmr.msrb.gmra.mxu3 %vm273_vm0, %v1066_v23 }
  0xc2   : > { %v289_v26 = vpop.f32.mrf.mxu0  ;;  %v358_v27 = vpop.f32.mrf.mxu1 }
  0xc3   : > { %v369_v28 = vsel %vm367_vm1, %v358_v27, -1e+30  ;;  %v300_v29 = vsel %vm367_vm1, %v289_v26, -1e+30  ;;  %v310_v30 = vmul.f32 %v1461_v25, %v289_v26  ;;  %v379_v34 = vmul.f32 %v1461_v25, %v358_v27 }
  0xc4   : > { %v371_v31 = vsel %vm273_vm0, %v369_v28, -inf  ;;  %v302_v32 = vsel %vm273_vm0, %v300_v29, -inf }
  0xc5   : > { %372 = vmax.xlane.f32.xlu2 %v371_v31  ;;  %303 = vmax.xlane.f32.xlu0 %v302_v32  ;;  %v312_v33 = vsel %vm273_vm0, %v310_v30, 0.0  ;;  %v381_v38 = vsel %vm273_vm0, %v379_v34, 0.0 }
  0xc6   : > { %313 = vadd.xlane.f32.xlu1 %v312_v33 }
  0xca   : > { %v291_v43 = vpop.f32.mrf.mxu0  ;;  %v360_v50 = vpop.f32.mrf.mxu1 }
  0xcb   : > { %v427_v35 = vpop.f32.mrf.mxu2  ;;  %v496_v42 = vpop.f32.mrf.mxu3  ;;  %v311_v46 = vmul.f32 %v1479_v41, %v291_v43  ;;  %v380_v51 = vmul.f32 %v1479_v41, %v360_v50  ;;  %v370_v52 = vsel %vm368_vm2, %v360_v50, -1e+30  ;;  %v301_v53 = vsel %vm368_vm2, %v291_v43, -1e+30 }
  0xcc   : > { %v448_v36 = vmul.f32 %v1461_v25, %v427_v35  ;;  %v438_v37 = vsel %vm367_vm1, %v427_v35, -1e+30  ;;  %v517_v44 = vmul.f32 %v1461_v25, %v496_v42  ;;  %v507_v45 = vsel %vm367_vm1, %v496_v42, -1e+30 }
  0xcd   : > { %v440_v39 = vsel %vm273_vm0, %v438_v37, -inf  ;;  %382 = vadd.xlane.f32.xlu0 %v381_v38  ;;  %v509_v48 = vsel %vm273_vm0, %v507_v45, -inf  ;;  %v315_v49 = vsel %vm273_vm0, %v311_v46, 0.0  ;;  %v374_v54 = vsel %vm273_vm0, %v370_v52, -inf }
  0xce   : > { %v450_v40 = vsel %vm273_vm0, %v448_v36, 0.0  ;;  %441 = vmax.xlane.f32.xlu2 %v440_v39  ;;  %v519_v47 = vsel %vm273_vm0, %v517_v44, 0.0  ;;  %v305_v55 = vsel %vm273_vm0, %v301_v53, -inf  ;;  %v384_v57 = vsel %vm273_vm0, %v380_v51, 0.0 }
  0xcf   : > { %451 = vadd.xlane.f32.xlu1 %v450_v40 }
  0xd2   : > { %v634_v0 = vpop.f32.mrf.mxu1  ;;  %v565_v2 = vpop.f32.mrf.mxu0 }
  0xd3   : > { %v429_v56 = vpop.f32.mrf.mxu2  ;;  %v498_v58 = vpop.f32.mrf.mxu3  ;;  %v645_v3 = vsel %vm367_vm1, %v634_v0, -1e+30  ;;  %v576_v5 = vsel %vm367_vm1, %v565_v2, -1e+30  ;;  %v655_v11 = vmul.f32 %v1461_v25, %v634_v0  ;;  %v586_v12 = vmul.f32 %v1461_v25, %v565_v2 }
  0xd4   : > { %v449_v59 = vmul.f32 %v1479_v41, %v429_v56  ;;  %v439_v60 = vsel %vm368_vm2, %v429_v56, -1e+30  ;;  %v508_v61 = vsel %vm368_vm2, %v498_v58, -1e+30  ;;  %v518_v4 = vmul.f32 %v1479_v41, %v498_v58 }
  0xd5   : > { %510 = vmax.xlane.f32.xlu0 %v509_v48  ;;  %v443_v63 = vsel %vm273_vm0, %v439_v60, -inf  ;;  %v512_v1 = vsel %vm273_vm0, %v508_v61, -inf  ;;  %v647_v6 = vsel %vm273_vm0, %v645_v3, -inf  ;;  %v578_v7 = vsel %vm273_vm0, %v576_v5, -inf }
  0xd6   : > { %520 = vadd.xlane.f32.xlu2 %v519_v47  ;;  %v453_v62 = vsel %vm273_vm0, %v449_v59, 0.0  ;;  %v522_v9 = vsel %vm273_vm0, %v518_v4, 0.0  ;;  %v657_v14 = vsel %vm273_vm0, %v655_v11, 0.0  ;;  %v588_v15 = vsel %vm273_vm0, %v586_v12, 0.0 }
  0xd7   : > { %316 = vadd.xlane.f32.xlu1 %v315_v49 }
  0xda   : > { %v567_v16 = vpop.f32.mrf.mxu0  ;;  %v636_v24 = vpop.f32.mrf.mxu1 }
  0xdb   : > { %v703_v8 = vpop.f32.mrf.mxu2  ;;  %v772_v17 = vpop.f32.mrf.mxu3  ;;  %v577_v20 = vsel %vm368_vm2, %v567_v16, -1e+30  ;;  %v656_v26 = vmul.f32 %v1479_v41, %v636_v24  ;;  %v587_v27 = vmul.f32 %v1479_v41, %v567_v16  ;;  %v646_v28 = vsel %vm368_vm2, %v636_v24, -1e+30 }
  0xdc   : > { %v724_v10 = vmul.f32 %v1461_v25, %v703_v8  ;;  %v714_v18 = vsel %vm367_vm1, %v703_v8, -1e+30  ;;  %v783_v19 = vsel %vm367_vm1, %v772_v17, -1e+30  ;;  %v581_v23 = vsel %vm273_vm0, %v577_v20, -inf }
  0xdd   : > { %306 = vmax.xlane.f32.xlu0 %v305_v55  ;;  %v716_v21 = vsel %vm273_vm0, %v714_v18, -inf  ;;  %v785_v22 = vsel %vm273_vm0, %v783_v19, -inf  ;;  %v660_v29 = vsel %vm273_vm0, %v656_v26, 0.0  ;;  %v650_v30 = vsel %vm273_vm0, %v646_v28, -inf }
  0xde   : > { %375 = vmax.xlane.f32.xlu2 %v374_v54  ;;  %v726_v13 = vsel %vm273_vm0, %v724_v10, 0.0  ;;  %v591_v32 = vsel %vm273_vm0, %v587_v27, 0.0  ;;  %v793_v40 = vmul.f32 %v1461_v25, %v772_v17 }
  0xdf   : > { %385 = vadd.xlane.f32.xlu1 %v384_v57 }
  0xe0   : > { %v795_v43 = vsel %vm273_vm0, %v793_v40, 0.0 }
  0xe3   : > { %v705_v31 = vpop.f32.mrf.mxu2  ;;  %v774_v33 = vpop.f32.mrf.mxu3 }
  0xe4   : > { %v725_v34 = vmul.f32 %v1479_v41, %v705_v31  ;;  %v784_v35 = vsel %vm368_vm2, %v774_v33, -1e+30  ;;  %v715_v36 = vsel %vm368_vm2, %v705_v31, -1e+30  ;;  %v794_v42 = vmul.f32 %v1479_v41, %v774_v33 }
  0xe5   : > { %444 = vmax.xlane.f32.xlu0 %v443_v63  ;;  %v788_v37 = vsel %vm273_vm0, %v784_v35, -inf  ;;  %v719_v39 = vsel %vm273_vm0, %v715_v36, -inf }
  0xe6   : > { %454 = vadd.xlane.f32.xlu2 %v453_v62  ;;  %v729_v38 = vsel %vm273_vm0, %v725_v34, 0.0  ;;  %v798_v44 = vsel %vm273_vm0, %v794_v42, 0.0 }
  0xe7   : > { %513 = vmax.xlane.f32.xlu1 %v512_v1 }
  0xed   : > { %523 = vadd.xlane.f32.xlu0 %v522_v9 }
  0xee   : > { %648 = vmax.xlane.f32.xlu2 %v647_v6 }
  0xef   : > { %579 = vmax.xlane.f32.xlu1 %v578_v7 }
  0xf5   : > { %589 = vadd.xlane.f32.xlu0 %v588_v15 }
  0xf6   : > { %727 = vadd.xlane.f32.xlu2 %v726_v13 }
  0xf7   : > { %658 = vadd.xlane.f32.xlu1 %v657_v14 }
  0xfd   : > { %717 = vmax.xlane.f32.xlu0 %v716_v21 }
  0xfe   : > { %582 = vmax.xlane.f32.xlu2 %v581_v23 }
  0xff   : > { %786 = vmax.xlane.f32.xlu1 %v785_v22 }
 0x105   : > { %651 = vmax.xlane.f32.xlu0 %v650_v30 }
 0x106   : > { %661 = vadd.xlane.f32.xlu2 %v660_v29 }
 0x107   : > { %592 = vadd.xlane.f32.xlu1 %v591_v32 }
 0x10d   : > { %730 = vadd.xlane.f32.xlu0 %v729_v38 }
 0x10e   : > { %789 = vmax.xlane.f32.xlu2 %v788_v37 }
 0x10f   : > { %720 = vmax.xlane.f32.xlu1 %v719_v39 }
 0x115   : > { %796 = vadd.xlane.f32.xlu0 %v795_v43 }
 0x117   : > { %799 = vadd.xlane.f32.xlu1 %v798_v44 }
 0x138   : > { %v373_v45 = vpop.xlane.xlu2 %372  ;;  %v304_v46 = vpop.xlane.xlu0 %303 }
 0x139   : > { %v308_v47 = vmax.f32 %v304_v46, -1e+30  ;;  %v314_v48 = vpop.xlane.xlu1 %313  ;;  %v377_v41 = vmax.f32 %v373_v45, -1e+30 }
 0x13a   : > { %v320_v49 = vmul.f32 0.0625, %v314_v48 }
 0x13c   : > { %v322_v25 = vsub.f32 %v308_v47, %v320_v49 }
 0x13e   : > { %325 = vst.msk [vmem:[%s1551_s30] sm:$0xff] %vm324_vm3, %v322_v25 }
 0x140   : > { %v383_v51 = vpop.xlane.xlu0 %382 }
 0x141   : > { %v442_v50 = vpop.xlane.xlu2 %441  ;;  %v389_v53 = vmul.f32 0.0625, %v383_v51 }
 0x142   : > { %v446_v52 = vmax.f32 %v442_v50, -1e+30  ;;  %v452_v54 = vpop.xlane.xlu1 %451 }
 0x143   : > { %v458_v55 = vmul.f32 0.0625, %v452_v54  ;;  %v391_v56 = vsub.f32 %v377_v41, %v389_v53 }
 0x145   : > { %v460_v57 = vsub.f32 %v446_v52, %v458_v55  ;;  %953 = vst.msk [vmem:[%s1551_s30 + $0x10] sm:$0xff] %vm324_vm3, %v391_v56 }
 0x147   : > { %968 = vst.msk [vmem:[%s1551_s30 + $0x20] sm:$0xff] %vm324_vm3, %v460_v57 }
 0x148   : > { %v511_v59 = vpop.xlane.xlu0 %510 }
 0x149   : > { %v521_v58 = vpop.xlane.xlu2 %520  ;;  %v515_v61 = vmax.f32 %v511_v59, -1e+30 }
 0x14a   : > { %v527_v60 = vmul.f32 0.0625, %v521_v58  ;;  %v317_v62 = vpop.xlane.xlu1 %316 }
 0x14b   : > { %v321_v2 = vmul.f32 0.0625, %v317_v62 }
 0x14c   : > { %v529_v63 = vsub.f32 %v515_v61, %v527_v60 }
 0x14e   : > { %983 = vst.msk [vmem:[%s1551_s30 + $0x30] sm:$0xff] %vm324_vm3, %v529_v63 }
 0x150   : > { %v307_v1 = vpop.xlane.xlu0 %306 }
 0x151   : > { %v376_v0 = vpop.xlane.xlu2 %375  ;;  %v309_v4 = vmax.f32 %v307_v1, -1e+30 }
 0x152   : > { %v378_v3 = vmax.f32 %v376_v0, -1e+30  ;;  %v386_v5 = vpop.xlane.xlu1 %385 }
 0x153   : > { %v390_v6 = vmul.f32 0.0625, %v386_v5  ;;  %v323_v7 = vsub.f32 %v309_v4, %v321_v2 }
 0x155   : > { %v392_v8 = vsub.f32 %v378_v3, %v390_v6  ;;  %326 = vst.msk [vmem:[%s1551_s30 + $0x8] sm:$0xff] %vm324_vm3, %v323_v7 }
 0x157   : > { %954 = vst.msk [vmem:[%s1551_s30 + $0x18] sm:$0xff] %vm324_vm3, %v392_v8 }
 0x158   : > { %v445_v10 = vpop.xlane.xlu0 %444 }
 0x159   : > { %v455_v9 = vpop.xlane.xlu2 %454  ;;  %v447_v12 = vmax.f32 %v445_v10, -1e+30 }
 0x15a   : > { %v459_v11 = vmul.f32 0.0625, %v455_v9  ;;  %v514_v13 = vpop.xlane.xlu1 %513 }
 0x15b   : > { %v516_v17 = vmax.f32 %v514_v13, -1e+30 }
 0x15c   : > { %v461_v14 = vsub.f32 %v447_v12, %v459_v11 }
 0x15e   : > { %969 = vst.msk [vmem:[%s1551_s30 + $0x28] sm:$0xff] %vm324_vm3, %v461_v14 }
 0x160   : > { %v524_v16 = vpop.xlane.xlu0 %523 }
 0x161   : > { %v649_v15 = vpop.xlane.xlu2 %648  ;;  %v528_v18 = vmul.f32 0.0625, %v524_v16 }
 0x162   : > { %v580_v19 = vpop.xlane.xlu1 %579  ;;  %v653_v21 = vmax.f32 %v649_v15, -1e+30 }
 0x163   : > { %v530_v20 = vsub.f32 %v516_v17, %v528_v18  ;;  %v584_v24 = vmax.f32 %v580_v19, -1e+30 }
 0x165   : > { %984 = vst.msk [vmem:[%s1551_s30 + $0x38] sm:$0xff] %vm324_vm3, %v530_v20 }
 0x168   : > { %v590_v23 = vpop.xlane.xlu0 %589 }
 0x169   : > { %v728_v22 = vpop.xlane.xlu2 %727  ;;  %v596_v26 = vmul.f32 0.0625, %v590_v23 }
 0x16a   : > { %v659_v27 = vpop.xlane.xlu1 %658  ;;  %v734_v31 = vmul.f32 0.0625, %v728_v22 }
 0x16b   : > { %v665_v28 = vmul.f32 0.0625, %v659_v27  ;;  %v598_v29 = vsub.f32 %v584_v24, %v596_v26 }
 0x16d   : > { %v667_v30 = vsub.f32 %v653_v21, %v665_v28  ;;  %998 = vst.msk [vmem:[%s1551_s30 + $0x40] sm:$0xff] %vm324_vm3, %v598_v29 }
 0x16f   : > { %1013 = vst.msk [vmem:[%s1551_s30 + $0x50] sm:$0xff] %vm324_vm3, %v667_v30 }
 0x170   : > { %v718_v33 = vpop.xlane.xlu0 %717 }
 0x171   : > { %v583_v32 = vpop.xlane.xlu2 %582  ;;  %v722_v34 = vmax.f32 %v718_v33, -1e+30 }
 0x172   : > { %v787_v35 = vpop.xlane.xlu1 %786  ;;  %v585_v43 = vmax.f32 %v583_v32, -1e+30 }
 0x173   : > { %v736_v36 = vsub.f32 %v722_v34, %v734_v31  ;;  %v791_v52 = vmax.f32 %v787_v35, -1e+30 }
 0x175   : > { %1028 = vst.msk [vmem:[%s1551_s30 + $0x60] sm:$0xff] %vm324_vm3, %v736_v36 }
 0x178   : > { %v652_v38 = vpop.xlane.xlu0 %651 }
 0x179   : > { %v662_v37 = vpop.xlane.xlu2 %661  ;;  %v654_v40 = vmax.f32 %v652_v38, -1e+30 }
 0x17a   : > { %v666_v39 = vmul.f32 0.0625, %v662_v37  ;;  %v593_v42 = vpop.xlane.xlu1 %592 }
 0x17b   : > { %v597_v44 = vmul.f32 0.0625, %v593_v42 }
 0x17c   : > { %v668_v45 = vsub.f32 %v654_v40, %v666_v39 }
 0x17d   : > { %v599_v46 = vsub.f32 %v585_v43, %v597_v44 }
 0x17e   : > { %1014 = vst.msk [vmem:[%s1551_s30 + $0x58] sm:$0xff] %vm324_vm3, %v668_v45 }
 0x17f   : > { %999 = vst.msk [vmem:[%s1551_s30 + $0x48] sm:$0xff] %vm324_vm3, %v599_v46 }
 0x180   : > { %v731_v47 = vpop.xlane.xlu0 %730 }
 0x181   : > { %v735_v48 = vmul.f32 0.0625, %v731_v47  ;;  %v790_v50 = vpop.xlane.xlu2 %789 }
 0x182   : > { %v721_v49 = vpop.xlane.xlu1 %720  ;;  %v792_v55 = vmax.f32 %v790_v50, -1e+30 }
 0x183   : > { %v723_v25 = vmax.f32 %v721_v49, -1e+30 }
 0x185   : > { %v737_v41 = vsub.f32 %v723_v25, %v735_v48 }
 0x187   : > { %1029 = vst.msk [vmem:[%s1551_s30 + $0x68] sm:$0xff] %vm324_vm3, %v737_v41 }
 0x188   : > { %v797_v51 = vpop.xlane.xlu0 %796 }
 0x189   : > { %v803_v53 = vmul.f32 0.0625, %v797_v51 }
 0x18a   : > { %v800_v54 = vpop.xlane.xlu1 %799 }
 0x18b   : > { %v804_v56 = vmul.f32 0.0625, %v800_v54  ;;  %v805_v57 = vsub.f32 %v791_v52, %v803_v53 }
 0x18d   : > { %v806_v58 = vsub.f32 %v792_v55, %v804_v56  ;;  %1043 = vst.msk [vmem:[%s1551_s30 + $0x70] sm:$0xff] %vm324_vm3, %v805_v57 }
 0x18f   : > { %1044 = vst.msk [vmem:[%s1551_s30 + $0x78] sm:$0xff] %vm324_vm3, %v806_v58 }
 0x190 PF: > { %p16_p4 = scmp.ge.s32.totalorder %s1357_s24, 4   ;;  %s1605_s12 = smov %s1281_s13 }
 0x191   : > { %s1606_s13 = smov %s1285_s14  ;;  %s1607_s14 = smov %s1370_s29 }
 0x192   : > { %s1608_s15 = smov %s1357_s24  ;;  %18 = sbr.rel (!%p16_p4) target bundleno = 5 (0x5), region = 110 }
 0x197   :  { %834 = vsyncpa [#allocation3], 1 }
 0x198   :  { %836 = vsyncpa [#allocation3 + $0x1], 1 }
 0x199   :  { %837 = vsyncpa [#allocation5], 1 }
 0x19a   :  { %839 = vsyncpa [#allocation5 + $0x1], 1 }

</bundles_post_ra>
